<compile_context>
chip_gen: v6e
topology: v6e:2x2x1
jax: 0.10.0
libtpu: 0.0.40
codegen_flags: <defaults>
</compile_context>

<pallas_src>
import jax
import jax.numpy as jnp
from jax import lax
from jax.experimental import pallas as pl
from jax.experimental.pallas import tpu as pltpu

LANE = 128      # feature dims padded to multiples of the lane width
SUBLANE = 8     # sublane quantum for streamed batch tiles
OUT_ROWS = 8    # packed-output rows (full sublane -> aligned stores)


def _round_up(n: int, m: int) -> int:
    return ((n + m - 1) // m) * m


def _cdiv(a: int, b: int) -> int:
    return -(-a // b)


def _make_mlp_kernel(n_relu: int):
    """Fused MLP body.

    Ref order: (x, w0, b0, ..., w_{n_relu-1}, b_{n_relu-1}, w_last, b_last, out)
      x      : (TB, F)      f32  (cast to bf16 in-kernel)
      w_i    : (K_i, H_i)   bf16 (VMEM-resident, zero-padded)
      b_i    : (1, H_i)     f32
      w_last : (8, H_pad)   bf16 (hidden->1 weight replicated into 8 rows)
      b_last : (1, 1)       f32  (SMEM scalar)
      out    : (8, TB)      f32  (lane-dense packed result; row 0 is real)
    """

    def kernel(*refs):
        x_ref = refs[0]
        o_ref = refs[-1]
        b_last_ref = refs[-2]
        w_last_ref = refs[-3]

        h = x_ref[...].astype(jnp.bfloat16)                  # (TB, F)
        for li in range(n_relu):
            w = refs[1 + 2 * li][...]                        # (K, H) bf16
            b = refs[2 + 2 * li][...]                        # (1, H) f32
            acc = jnp.dot(h, w, preferred_element_type=jnp.float32) + b
            h = jnp.maximum(acc, 0.0).astype(jnp.bfloat16)   # (TB, H) bf16

        # Final hidden->1 layer, packed lane-dense on the MXU:
        #   (8, H) . (TB, H)^T -> (8, TB); all 8 rows identical (weight rows
        #   are replicas), so the (8, TB) store is fully aligned and row 0 of
        #   the output carries the per-row scalars.
        out = lax.dot_general(
            w_last_ref[...], h,
            dimension_numbers=(((1,), (1,)), ((), ())),
            preferred_element_type=jnp.float32)
        o_ref[...] = out + b_last_ref[0, 0]

    return kernel


def prepare_simple_net_params(weights, biases):
    """One-time (hoisted) padding + bf16 cast of SimpleNet parameters.

    weights: list of (in, out) f32 arrays (transpose of PyTorch's (out, in)),
             last one is (hidden, 1).
    biases:  list of (1, out) f32 arrays.
    Returns a flat tuple (w0, b0, ..., w_last, b_last) ready for the kernel.
    Padded lanes stay exactly zero through every matmul/ReLU, so results are
    identical to the unpadded math.
    """
    n_linear = len(weights)
    n_relu = n_linear - 1
    params = []
    for i in range(n_relu):
        w = weights[i]
        b = biases[i]
        k, n = int(w.shape[0]), int(w.shape[1])
        n_pad = _round_up(n, LANE)
        k_pad = k if i == 0 else _round_up(k, LANE)   # first layer matches raw x
        wp = jnp.zeros((k_pad, n_pad), jnp.bfloat16)
        wp = wp.at[:k, :n].set(w.astype(jnp.bfloat16))
        bp = jnp.zeros((1, n_pad), jnp.float32)
        bp = bp.at[:, :n].set(jnp.asarray(b, jnp.float32).reshape(1, n))
        params += [wp, bp]

    # Final hidden->1 layer: replicate the weight column into 8 rows so the
    # kernel can emit an aligned (8, TB) packed output block.
    w_f = weights[-1]                                  # (H, 1)
    H = int(w_f.shape[0])
    H_pad = _round_up(H, LANE)
    w_last = jnp.zeros((OUT_ROWS, H_pad), jnp.bfloat16)
    w_last = w_last.at[:, :H].set(
        jnp.broadcast_to(w_f[:, 0].astype(jnp.bfloat16), (OUT_ROWS, H)))
    b_last = jnp.asarray(biases[-1], jnp.float32).reshape(1, 1)
    params += [w_last, b_last]
    return tuple(params)


def simple_net_forward(x, params, *, tile_b: int = 512):
    """Fused SimpleNet forward.

    x:      (B, input_size) float32
    params: output of prepare_simple_net_params (padded/cast once, reused)
    returns (B, 1) float32
    """
    B, F = int(x.shape[0]), int(x.shape[1])
    n_relu = (len(params) - 2) // 2
    w_last, b_last = params[-2], params[-1]
    H_pad = int(w_last.shape[1])

    # Batch tiling: single tile for small B; otherwise lane-aligned tiles with
    # at least 2 grid steps (v7x megacore) and a partial last tile if needed.
    if B <= 256:
        TB = _round_up(B, SUBLANE)
    else:
        TB = min(_round_up(tile_b, LANE), _round_up(_cdiv(B, 2), LANE))
        TB = max(TB, LANE)
    G = _cdiv(B, TB)
    B_pad = G * TB

    # x / out stream with the grid; weights & biases are VMEM-resident
    # (constant block index -> fetched once); final bias is an SMEM scalar.
    in_specs = [pl.BlockSpec((TB, F), lambda i: (i, 0))]
    for p in params[:-2]:
        in_specs.append(pl.BlockSpec(p.shape, lambda i: (0, 0)))
    in_specs.append(pl.BlockSpec(w_last.shape, lambda i: (0, 0)))
    in_specs.append(pl.BlockSpec(memory_space=pltpu.MemorySpace.SMEM))
    out_specs = pl.BlockSpec((OUT_ROWS, TB), lambda i: (0, i))

    # VMEM budget: resident params (double-buffered by default), streamed
    # x/out tiles, live f32 accumulator + bf16 h, plus spill headroom.
    param_bytes = sum(int(p.size) * p.dtype.itemsize for p in params[:-1])
    io_bytes = 2 * (TB * F * 4) + 2 * (OUT_ROWS * TB * 4)
    interm_bytes = 2 * TB * H_pad * (4 + 2)
    needed = 2 * param_bytes + io_bytes + interm_bytes + (4 << 20)
    try:
        vmem_cap = int(pltpu.get_tpu_info().vmem_capacity_bytes)
    except Exception:
        vmem_cap = 64 << 20
    vmem_limit = int(min(max(needed, 32 << 20), vmem_cap - (4 << 20)))

    flops = 2 * B_pad * sum(
        int(params[2 * i].shape[0]) * int(params[2 * i].shape[1])
        for i in range(n_relu))
    flops += 2 * B_pad * int(w_last.shape[0]) * int(w_last.shape[1])
    bytes_accessed = B * F * 4 + OUT_ROWS * B_pad * 4 + param_bytes

    out_packed = pl.pallas_call(
        _make_mlp_kernel(n_relu),
        out_shape=jax.ShapeDtypeStruct((OUT_ROWS, B_pad), jnp.float32),
        grid=(G,),
        in_specs=in_specs,
        out_specs=out_specs,
        compiler_params=pltpu.CompilerParams(
            dimension_semantics=("parallel",),
            vmem_limit_bytes=vmem_limit,
        ),
        cost_estimate=pl.CostEstimate(
            flops=int(flops), transcendentals=0,
            bytes_accessed=int(bytes_accessed)),
    )(x, *params)

    # Row 0 holds the packed per-row scalars; columns >= B (partial tile) are
    # discarded here.
    return out_packed[0, :B].reshape(B, 1)


def init_simple_net_params(key, input_size: int, hidden_size: int, n_layers: int):
    """Deterministic init mirroring SimpleNet.__init__ layer shapes.

    Layer sizes: input->hidden, (hidden->hidden) * n_layers, hidden->1.
    Weights stored as (in, out) == transpose of PyTorch's (out, in).
    """
    dims = [(input_size, hidden_size)]
    for _ in range(n_layers):
        dims.append((hidden_size, hidden_size))
    dims.append((hidden_size, 1))

    weights, biases = [], []
    for fan_in, fan_out in dims:
        key, kw, kb = jax.random.split(key, 3)
        bound = 1.0 / jnp.sqrt(jnp.float32(fan_in))
        w = jax.random.uniform(kw, (fan_in, fan_out), jnp.float32, -bound, bound)
        b = jax.random.uniform(kb, (1, fan_out), jnp.float32, -bound, bound)
        weights.append(w)
        biases.append(b)
    return weights, biases


def simple_net_reference(x, weights, biases):
    """Plain-JAX f32 reference of the same forward pass."""
    h = x
    n = len(weights)
    for i, (w, b) in enumerate(zip(weights, biases)):
        h = h @ w + b
        if i < n - 1:
            h = jnp.maximum(h, 0.0)
    return h


def _run_case(key, batch, input_size, hidden_size, n_layers):
    key, kx = jax.random.split(key)
    x = jax.random.normal(kx, (batch, input_size), jnp.float32)
    weights, biases = init_simple_net_params(key, input_size, hidden_size, n_layers)
    params = prepare_simple_net_params(weights, biases)   # hoisted, do once

    out = simple_net_forward(x, params)
    out = jax.block_until_ready(out)

    ref = simple_net_reference(x, weights, biases)
    assert out.shape == (batch, 1), out.shape
    # bf16 MXU operands with f32 accumulation -> relaxed tolerance vs f32 ref.
    assert jnp.allclose(out, ref, atol=5e-2, rtol=5e-2), "mismatch vs reference"


if __name__ == "__main__":
    key = jax.random.PRNGKey(0)
    key, k1, k2 = jax.random.split(key, 3)

    # Small shapes consistent with the module's forward: (batch, input_size).
    _run_case(k1, batch=8, input_size=4, hidden_size=32, n_layers=1)
    # A slightly deeper/wider config exercising the same fused path.
    _run_case(k2, batch=64, input_size=6, hidden_size=32, n_layers=2)

    print("KERNEL_OK")
</pallas_src>

<mosaic_0001>
module attributes {stable_mosaic.version = 11 : i64} {
  func.func @kernel(%arg0: i32, %arg1: memref<8x4xf32, #tpu.memory_space<vmem>>, %arg2: memref<4x128xbf16, #tpu.memory_space<vmem>>, %arg3: memref<1x128xf32, #tpu.memory_space<vmem>>, %arg4: memref<128x128xbf16, #tpu.memory_space<vmem>>, %arg5: memref<1x128xf32, #tpu.memory_space<vmem>>, %arg6: memref<8x128xbf16, #tpu.memory_space<vmem>>, %arg7: memref<1x1xf32, #tpu.memory_space<smem>>, %arg8: memref<8x8xf32, #tpu.memory_space<vmem>>) attributes {dimension_semantics = [#tpu.dimension_semantics<parallel>], iteration_bounds = array<i64: 1>, scalar_prefetch = 0 : i64, scratch_operands = 0 : i64, tpu.core_type = #tpu.core_type<tc>, window_params = [{transform_indices = @transform_0, window_bounds = array<i64: 8, 4>}, {pipeline_mode = #tpu.pipeline_mode<synchronous>, transform_indices = @transform_1, window_bounds = array<i64: 4, 128>}, {pipeline_mode = #tpu.pipeline_mode<synchronous>, transform_indices = @transform_2, window_bounds = array<i64: 1, 128>}, {pipeline_mode = #tpu.pipeline_mode<synchronous>, transform_indices = @transform_3, window_bounds = array<i64: 128, 128>}, {pipeline_mode = #tpu.pipeline_mode<synchronous>, transform_indices = @transform_4, window_bounds = array<i64: 1, 128>}, {pipeline_mode = #tpu.pipeline_mode<synchronous>, transform_indices = @transform_5, window_bounds = array<i64: 8, 128>}, {transform_indices = @transform_6, window_bounds = array<i64: 1, 1>}, {transform_indices = @transform_7, window_bounds = array<i64: 8, 8>}]} {
    %c0 = arith.constant 0 : index
    %c0_0 = arith.constant 0 : index
    %0 = vector.load %arg1[%c0, %c0_0] : memref<8x4xf32, #tpu.memory_space<vmem>>, vector<8x4xf32>
    %1 = arith.truncf %0 : vector<8x4xf32> to vector<8x4xbf16>
    %c0_1 = arith.constant 0 : index
    %c0_2 = arith.constant 0 : index
    %2 = vector.load %arg2[%c0_1, %c0_2] : memref<4x128xbf16, #tpu.memory_space<vmem>>, vector<4x128xbf16>
    %c0_3 = arith.constant 0 : index
    %c0_4 = arith.constant 0 : index
    %3 = vector.load %arg3[%c0_3, %c0_4] : memref<1x128xf32, #tpu.memory_space<vmem>>, vector<1x128xf32>
    %cst = arith.constant dense<0.000000e+00> : vector<8x128xf32>
    %4 = tpu.matmul %1, %2, %cst {dimension_numbers = #tpu.dot_dimension_numbers<[1], [0], [0], [1], [0, 0, 1, 1], [], []>} : vector<8x4xbf16>, vector<4x128xbf16>, vector<8x128xf32> -> vector<8x128xf32>
    %5 = vector.broadcast %3 : vector<1x128xf32> to vector<8x128xf32>
    %6 = arith.addf %4, %5 : vector<8x128xf32>
    %cst_5 = arith.constant 0.000000e+00 : f32
    %7 = vector.broadcast %cst_5 : f32 to vector<8x128xf32>
    %8 = arith.maximumf %6, %7 : vector<8x128xf32>
    %9 = arith.truncf %8 : vector<8x128xf32> to vector<8x128xbf16>
    %c0_6 = arith.constant 0 : index
    %c0_7 = arith.constant 0 : index
    %10 = vector.load %arg4[%c0_6, %c0_7] : memref<128x128xbf16, #tpu.memory_space<vmem>>, vector<128x128xbf16>
    %c0_8 = arith.constant 0 : index
    %c0_9 = arith.constant 0 : index
    %11 = vector.load %arg5[%c0_8, %c0_9] : memref<1x128xf32, #tpu.memory_space<vmem>>, vector<1x128xf32>
    %cst_10 = arith.constant dense<0.000000e+00> : vector<8x128xf32>
    %12 = tpu.matmul %9, %10, %cst_10 {dimension_numbers = #tpu.dot_dimension_numbers<[1], [0], [0], [1], [0, 0, 1, 1], [], []>} : vector<8x128xbf16>, vector<128x128xbf16>, vector<8x128xf32> -> vector<8x128xf32>
    %13 = vector.broadcast %11 : vector<1x128xf32> to vector<8x128xf32>
    %14 = arith.addf %12, %13 : vector<8x128xf32>
    %cst_11 = arith.constant 0.000000e+00 : f32
    %15 = vector.broadcast %cst_11 : f32 to vector<8x128xf32>
    %16 = arith.maximumf %14, %15 : vector<8x128xf32>
    %17 = arith.truncf %16 : vector<8x128xf32> to vector<8x128xbf16>
    %c0_12 = arith.constant 0 : index
    %c0_13 = arith.constant 0 : index
    %18 = vector.load %arg6[%c0_12, %c0_13] : memref<8x128xbf16, #tpu.memory_space<vmem>>, vector<8x128xbf16>
    %cst_14 = arith.constant dense<0.000000e+00> : vector<8x8xf32>
    %19 = tpu.matmul %18, %17, %cst_14 {dimension_numbers = #tpu.dot_dimension_numbers<[1], [1], [0], [0], [0, 0, 1, 0], [], []>} : vector<8x128xbf16>, vector<8x128xbf16>, vector<8x8xf32> -> vector<8x8xf32>
    %c0_15 = arith.constant 0 : index
    %c0_16 = arith.constant 0 : index
    %20 = memref.load %arg7[%c0_15, %c0_16] : memref<1x1xf32, #tpu.memory_space<smem>>
    %21 = vector.broadcast %20 : f32 to vector<8x8xf32>
    %22 = arith.addf %19, %21 : vector<8x8xf32>
    %c0_17 = arith.constant 0 : index
    %c0_18 = arith.constant 0 : index
    %23 = vector.load %arg8[%c0_17, %c0_18] : memref<8x8xf32, #tpu.memory_space<vmem>>, vector<8x8xf32>
    tpu.vector_store %arg8[%c0_17, %c0_18], %22 {strides = array<i32>} : memref<8x8xf32, #tpu.memory_space<vmem>>, vector<8x8xf32>,
    return
  }
  func.func @transform_0(%arg0: i32) -> (i32, i32) {
    %c0_i32 = arith.constant 0 : i32
    %c0_i32_0 = arith.constant 0 : i32
    return %arg0, %c0_i32 : i32, i32
  }
  func.func @transform_1(%arg0: i32) -> (i32, i32) {
    %c0_i32 = arith.constant 0 : i32
    %c0_i32_0 = arith.constant 0 : i32
    %c0_i32_1 = arith.constant 0 : i32
    return %c0_i32, %c0_i32_0 : i32, i32
  }
  func.func @transform_2(%arg0: i32) -> (i32, i32) {
    %c0_i32 = arith.constant 0 : i32
    %c0_i32_0 = arith.constant 0 : i32
    %c0_i32_1 = arith.constant 0 : i32
    return %c0_i32, %c0_i32_0 : i32, i32
  }
  func.func @transform_3(%arg0: i32) -> (i32, i32) {
    %c0_i32 = arith.constant 0 : i32
    %c0_i32_0 = arith.constant 0 : i32
    %c0_i32_1 = arith.constant 0 : i32
    return %c0_i32, %c0_i32_0 : i32, i32
  }
  func.func @transform_4(%arg0: i32) -> (i32, i32) {
    %c0_i32 = arith.constant 0 : i32
    %c0_i32_0 = arith.constant 0 : i32
    %c0_i32_1 = arith.constant 0 : i32
    return %c0_i32, %c0_i32_0 : i32, i32
  }
  func.func @transform_5(%arg0: i32) -> (i32, i32) {
    %c0_i32 = arith.constant 0 : i32
    %c0_i32_0 = arith.constant 0 : i32
    %c0_i32_1 = arith.constant 0 : i32
    return %c0_i32, %c0_i32_0 : i32, i32
  }
  func.func @transform_6(%arg0: i32) -> (i32, i32) {
    %c0_i32 = arith.constant 0 : i32
    %c0_i32_0 = arith.constant 0 : i32
    %c0_i32_1 = arith.constant 0 : i32
    return %c0_i32, %c0_i32_0 : i32, i32
  }
  func.func @transform_7(%arg0: i32) -> (i32, i32) {
    %c0_i32 = arith.constant 0 : i32
    %c0_i32_0 = arith.constant 0 : i32
    return %c0_i32, %arg0 : i32, i32
  }
}

</mosaic_0001>

<bundles_post_ra>
// kernel: tpu_custom_call.1
= control target key start
LH: loop header
LB: loop body
LE: loop exit
PB: predicated region body
PF: predicated region fallthrough
CT: control target
= control target key end

     0   :  { %13 = vsyncpa [#allocation4], 0  ;;  %s463_s0 = inlined_call_operand.vmem [shape: f32[8,4], index: 0, kind: input, shape index: {}]   ;;  %s464_s1 = inlined_call_operand.vmem [shape: bf16[4,128], index: 1, kind: input, shape index: {}]   ;;  %s465_s2 = inlined_call_operand.vmem [shape: f32[1,128], index: 2, kind: input, shape index: {}]   ;;  %s466_s3 = inlined_call_operand.hbm [shape: bf16[128,128], index: 3, kind: input, shape index: {}]   ;;  %s467_s4 = inlined_call_operand.vmem [shape: f32[1,128], index: 4, kind: input, shape index: {}]   ;;  %s468_s5 = inlined_call_operand.vmem [shape: bf16[8,128], index: 5, kind: input, shape index: {}]   ;;  %s469_s6 = inlined_call_operand.<no memory space> [shape: f32[1,1], index: 6, kind: input, shape index: {}]   ;;  %s470_s7 = inlined_call_operand.hbm [shape: f32[8,8], index: 7, kind: output, shape index: {}]  }
   0x1   :  { %14 = vsyncpa [#allocation5], 0  ;;  %s390_s24 = smov [#allocation3]  }
   0x2   :  { %s26_s25 = sshll.u32 %s390_s24, 4  ;;  %s27_s25 = int_to_ptr.vmem [resolvable:$true] %s26_s25 }
   0x3   :  { %s354_s26 = scalar_lea.vmem %s27_s25, 1024  ;;  %p359_p1 = scmp.lt.s32.totalorder %s27_s25, %s27_s25 }
   0x4   :  { %p355_p0 = scmp.ne.s32.totalorder %s27_s25, %s354_s26  ;;  %p360_p2 = scmp.lt.s32.totalorder %s354_s26, %s354_s26 }
   0x6   :  { %p361_p3 = por %p360_p2, %p359_p1 }
   0x8   :  { %p362_p4 = pnand %p361_p3, %p355_p0 }
   0xa   :  { %365 = shalt.err (!%p362_p4)
}
   0xb   :  { %s391_s27 = smov 64   ;;  %s392_s28 = smov 4  }
   0xc   :  { %32 = dma.hbm_to_vmem [thread:$0]  %s466_s3, 1024, %s27_s25, [#allocation4], %s391_s27, %s391_s27, %s392_s28  }
   0xd   :  { %386 = dma.done.wait [#allocation4], 1024  }
   0xe   :  { %387 = vsyncadd [#allocation4], 4294966272  ;;  %v393_v0 = vmov 0.0   ;;  %vm394_vm0 = vmmov 0   ;;  %vm57_vm1 = vcmask 1041408   ;;  %v43_v2 = vld [vmem:[%s463_s0] sm:$0xff]  ;;  %v218_v30 = vstv %s469_s6 }
   0xf   :  { %300 = vmatprep.subr.bf16.mxu0 %v393_v0  ;;  %302 = vmatprep.mubr.msk.bf16.mxu0 %vm394_vm0, %v393_v0  ;;  %v45_v1 = vld [vmem:[%s464_s1] sm:$0x3]  ;;  %v44_v4 = vpack.c.bf16 %v43_v2, %v43_v2  ;;  %v338_v5 = vld [vmem:[#allocation3 + $0x38] sm:$0xff]   ;;  %vm53_vm2 = vcmask 31744   ;;  %v339_v6 = vld [vmem:[#allocation3 + $0x30] sm:$0xff]   ;;  %s395_s16 = smov [#allocation6]  }
  0x10   :  { %306 = vmatprep.subr.bf16.mxu1 %v393_v0  ;;  %322 = vmatprep.mubr.msk.bf16.mxu1 %vm394_vm0, %v393_v0  ;;  %v59_v3 = vsel %vm57_vm1, %v45_v1, 0  ;;  %v340_v7 = vld [vmem:[#allocation3 + $0x28] sm:$0xff]   ;;  %v341_v8 = vld [vmem:[#allocation3 + $0x20] sm:$0xff]   ;;  %v342_v9 = vld [vmem:[#allocation3 + $0x18] sm:$0xff]   ;;  %s267_s17 = sshll.u32 %s395_s16, 4  ;;  %vm259_vm3 = vcmask 64512   ;;  %s268_s17 = int_to_ptr.vmem [resolvable:$true] %s267_s17 }
  0x11   :  { %301 = vmatpush3.bf16.msra.mxu0 %v59_v3  ;;  %307 = vmatpush3.bf16.msra.mxu1 %v338_v5  ;;  %v343_v10 = vld [vmem:[#allocation3 + $0x10] sm:$0xff]   ;;  %v344_v11 = vld [vmem:[#allocation3 + $0x8] sm:$0xff]   ;;  %v345_v12 = vld [vmem:[#allocation3] sm:$0xff]   ;;  %p371_p6 = scmp.lt.s32.totalorder %s268_s17, %s268_s17 }
  0x12   :  { %326 = vmatprep.subr.bf16.mxu0 %v393_v0  ;;  %308 = vmatprep.subr.bf16.mxu1 %v393_v0  ;;  %v276_v13 = vld [vmem:[%s465_s2] ss:$0 sm:$0xff] }
  0x13   :  { %v278_v21 = vld [vmem:[%s467_s4] ss:$0 sm:$0xff]  ;;  %s366_s4 = scalar_lea.vmem %s268_s17, 128 }
  0x14   :  { %303 = vmatmul.mubr.msk.bf16.vlgmr.msra.gmra.mxu0 %vm53_vm2, %v44_v4  ;;  %v216_v29 = vld [vmem:[%s468_s5] sm:$0xf]  ;;  %p367_p5 = scmp.ne.s32.totalorder %s268_s17, %s366_s4  ;;  %p372_p7 = scmp.lt.s32.totalorder %s366_s4, %s366_s4 }
  0x15   :  { %328 = vmatprep.mubr.msk.bf16.mxu0 %vm394_vm0, %v393_v0  ;;  %309 = vmatpush3.bf16.msra.mxu1 %v339_v6 }
  0x16   :  { %310 = vmatprep.subr.bf16.mxu1 %v393_v0  ;;  %p373_p8 = por %p372_p7, %p371_p6 }
  0x18   :  { %p374_p9 = pnand %p373_p8, %p367_p5 }
  0x19   :  { %311 = vmatpush3.bf16.msra.mxu1 %v340_v7 }
  0x1a   :  { %312 = vmatprep.subr.bf16.mxu1 %v393_v0 }
  0x1d   :  { %313 = vmatpush3.bf16.msra.mxu1 %v341_v8 }
  0x1e   :  { %314 = vmatprep.subr.bf16.mxu1 %v393_v0 }
  0x21   :  { %315 = vmatpush3.bf16.msra.mxu1 %v342_v9 }
  0x22   :  { %316 = vmatprep.subr.bf16.mxu1 %v393_v0 }
  0x25   :  { %317 = vmatpush3.bf16.msra.mxu1 %v343_v10 }
  0x26   :  { %318 = vmatprep.subr.bf16.mxu1 %v393_v0 }
  0x29   :  { %319 = vmatpush3.bf16.msra.mxu1 %v344_v11 }
  0x2a   :  { %320 = vmatprep.subr.bf16.mxu1 %v393_v0 }
  0x2d   :  { %321 = vmatpush3.bf16.msra.mxu1 %v345_v12 }
  0xd4   :  { %v95_v14 = vpop.f32.mrf.mxu0 }
  0xd5   :  { %v96_v15 = vadd.f32 %v276_v13, %v95_v14 }
  0xd6   :  { %v304_v16 = vpop.f32.mrf.mxu0 }
  0xd7   :  { %v101_v17 = vmax.f32 %v96_v15, 0.0 }
  0xd8   :  { %v98_v18 = vpop.f32.mrf.mxu0 }
  0xd9   :  { %v102_v19 = vpack.c.bf16 %v101_v17, %v101_v17 }
  0xda   :  { %v305_v20 = vpop.f32.mrf.mxu0 }
  0xdb   :  { %323 = vmatmul.mubr.bf16.vlgmr.msra.gmra.mxu1 %v102_v19 }
 0x19b   :  { %v208_v22 = vpop.f32.mrf.mxu1 }
 0x19c   :  { %v209_v23 = vadd.f32 %v278_v21, %v208_v22 }
 0x19d   :  { %v324_v24 = vpop.f32.mrf.mxu1 }
 0x19e   :  { %v214_v25 = vmax.f32 %v209_v23, 0.0 }
 0x19f   :  { %v211_v26 = vpop.f32.mrf.mxu1 }
 0x1a0   :  { %v215_v27 = vpack.c.bf16 %v214_v25, %v214_v25 }
 0x1a1   :  { %v325_v28 = vpop.f32.mrf.mxu1 }
 0x1a2   :  { %327 = vmatpush3.bf16.xpose.msra.mxu0 %v215_v27 }
 0x1a9   :  { %329 = vmatmul.mubr.bf16.vlgmr.msra.gmra.mxu0 %v216_v29 }
 0x269   :  { %v253_v31 = vpop.f32.mrf.mxu0 }
 0x26a   :  { %v254_v32 = vadd.f32 %v253_v31, %v218_v30 }
 0x26b   :  { %v330_v33 = vpop.f32.mrf.mxu0 }
 0x26c   :  { %260 = vst.msk [vmem:[#allocation6] sm:$0xff] %vm259_vm3, %v254_v32 }
 0x26d   :  { %v256_v34 = vpop.f32.mrf.mxu0 }
 0x26e   :  { %377 = shalt.err (!%p374_p9)
}
 0x26f   :  { %270 = dma.vmem_to_hbm [thread:$0]  %s268_s17, 128, %s470_s7, [#allocation5]   ;;  %v331_v35 = vpop.f32.mrf.mxu0 }
 0x270   :  { %388 = dma.done.wait [#allocation5], 128  }
 0x271   :  { %389 = vsyncadd [#allocation5], 4294967168 }
 0x272   :  { %274 = vsyncpa [#allocation4], 1 }
 0x273   :  { %275 = vsyncpa [#allocation5], 1 }

</bundles_post_ra>
